<compile_context>
chip_gen: v7x
topology: tpu7x:2x2x1
jax: 0.10.0
libtpu: 0.0.40
codegen_flags: <defaults>
</compile_context>

<pallas_src>
import functools

import numpy as np
import jax
import jax.numpy as jnp
from jax.experimental import pallas as pl
from jax.experimental.pallas import tpu as pltpu


# --------------------------- one-time roll probe -----------------------------

@functools.lru_cache(maxsize=1)
def _roll_follows_jnp_convention():
    """True iff pltpu.roll(x, shift=1, axis=0)[i] == x[i-1] (jnp.roll semantics).

    Runs a tiny probe kernel exactly once, outside the forward hot path, so
    the fused kernel can bake the correct static shift direction and use one
    roll per tap.
    """
    def probe(x_ref, o_ref):
        o_ref[...] = pltpu.roll(x_ref[...], shift=1, axis=0)

    x = jnp.arange(8 * 128, dtype=jnp.float32).reshape(8, 128)
    y = pl.pallas_call(
        probe, out_shape=jax.ShapeDtypeStruct((8, 128), jnp.float32))(x)
    return bool(y[1, 0] == x[0, 0])


# ------------------------------ Pallas kernel --------------------------------

def _fused_cnn_kernel(x_ref, w1_ref, b1_ref, w2_ref, b2_ref, w3_ref, b3_ref,
                      p1_ref, p2_ref, pf_ref, wfc_ref, bf_ref, o_ref,
                      *, W, b_tile, n_pos, roll_fwd):
    """b_tile images per grid step; every activation stays in VMEM.

    Activations are stacked (b_tile * Hp * Wp, C) zero-ring padded-raster
    matrices.  Conv/pool values at padding rows (and any cross-image roll
    spill, which only lands in padding rows) are finite garbage that the
    block-diagonal 0/1 pool-selection matmuls zero out / discard.
    """

    def shifted(a, k):
        """s[i, :] = a[(i + k) % n, :] for a static python int k (one roll)."""
        n = a.shape[0]
        s = (-k) % n if roll_fwd else k % n
        if s == 0:
            return a
        return pltpu.roll(a, shift=s, axis=0)

    def conv3x3_relu(a, w_ref, b_ref, wp):
        """(M, Cin) padded raster -> relu(conv3x3 + b) as ONE MXU matmul.

        The 9 taps are folded into the contraction dim: im2col slab built with
        8 sublane rolls + one lane concat, weight pre-reshaped to (9*Cin, Cout).
        """
        taps = [shifted(a, dy * wp + dx)
                for dy in (-1, 0, 1) for dx in (-1, 0, 1)]
        slab = jnp.concatenate(taps, axis=-1)                 # (M, 9*Cin)
        z = jnp.dot(slab, w_ref[...], preferred_element_type=jnp.float32)
        return jnp.maximum(z + b_ref[...], 0.0)

    def pool2x2(y, wp):
        """ymax[i] = max(y[i], y[i+1], y[i+wp], y[i+wp+1]) (valid at anchors)."""
        yw = jnp.maximum(y, shifted(y, 1))
        return jnp.maximum(yw, shifted(yw, wp))

    x = x_ref[0]                                              # (b_tile*Hp*Wp, Cin)
    # ---- layer 1: H x W ----
    y1 = conv3x3_relu(x, w1_ref, b1_ref, W + 2)
    a2 = jnp.dot(p1_ref[...], pool2x2(y1, W + 2),
                 preferred_element_type=jnp.float32)
    # ---- layer 2: H/2 x W/2 ----
    y2 = conv3x3_relu(a2, w2_ref, b2_ref, W // 2 + 2)
    a3 = jnp.dot(p2_ref[...], pool2x2(y2, W // 2 + 2),
                 preferred_element_type=jnp.float32)
    # ---- layer 3: H/4 x W/4 ----
    y3 = conv3x3_relu(a3, w3_ref, b3_ref, W // 4 + 2)
    # ---- fused FC (PyTorch NCHW flatten order baked into pf / wfc) ----
    # pf is p-major across the batch tile: rows [p*b_tile:(p+1)*b_tile] select
    # pooled position p for every image, so the FC is n_pos batched
    # (b_tile, C3) x (C3, O) dots instead of 2*n_pos M=1 dots per image.
    sel = jnp.dot(pf_ref[...], pool2x2(y3, W // 4 + 2),
                  preferred_element_type=jnp.float32)         # (n_pos*b_tile, C3)
    out = bf_ref[...]                                         # (1, O), broadcasts
    for p in range(n_pos):
        out = out + jnp.dot(sel[p * b_tile:(p + 1) * b_tile, :], wfc_ref[p],
                            preferred_element_type=jnp.float32)
    o_ref[0] = out                                            # (b_tile, O) slab


# ------------------------- one-time parameter prep ---------------------------

def _pool_select_matrix(H, W, repad):
    """Exact 0/1 compaction matrix for 2x2/stride-2 max-pool of an H x W layer
    whose pooled-max lives in an (H+2)*(W+2)-row padded raster.

    repad=True : rows index the NEXT layer's zero-ring padded raster; untouched
                 rows stay zero -> next conv's zero padding comes for free.
    repad=False: rows index the H/2*W/2 pooled positions in raster order.
    """
    hp, wp = H + 2, W + 2
    ho, wo = H // 2, W // 2
    if repad:
        hn, wn = ho + 2, wo + 2
        mat = np.zeros((hn * wn, hp * wp), np.float32)
        for i in range(ho):
            for j in range(wo):
                mat[(i + 1) * wn + (j + 1), (1 + 2 * i) * wp + (1 + 2 * j)] = 1.0
    else:
        mat = np.zeros((ho * wo, hp * wp), np.float32)
        for i in range(ho):
            for j in range(wo):
                mat[i * wo + j, (1 + 2 * i) * wp + (1 + 2 * j)] = 1.0
    return mat


def preprocess_params(params, image_size, b_tile):
    """One-time layout work (hoisted out of the per-forward hot path)."""
    H, W = image_size
    assert H % 8 == 0 and W % 8 == 0, "image_size must be divisible by 8"

    def conv_w(w):               # (Cout, Cin, 3, 3) -> (9*Cin, Cout), tap-major
        cout, cin = w.shape[0], w.shape[1]
        return jnp.transpose(w, (2, 3, 1, 0)).reshape(9 * cin, cout)

    num_out = params["wf"].shape[0]
    c3 = params["w3"].shape[0]
    hf, wfn = H // 8, W // 8
    n_pos = hf * wfn

    # PyTorch flattens NCHW: column = c*(hf*wfn) + h*wfn + w.  Slice the FC
    # weight per pooled spatial position p = h*wfn + w  ->  (n_pos, C3, O).
    wfc = jnp.transpose(params["wf"].reshape(num_out, c3, hf, wfn),
                        (2, 3, 1, 0)).reshape(n_pos, c3, num_out)

    # Block-diagonal pool-compaction matrices for a tile of b_tile stacked
    # images (O((H*W)^2 * b_tile^2) bytes -- see v7x scaling note up top).
    eye = np.eye(b_tile, dtype=np.float32)
    p1 = np.kron(eye, _pool_select_matrix(H, W, repad=True))
    p2 = np.kron(eye, _pool_select_matrix(H // 2, W // 2, repad=True))

    # FC selection, p-major across the batch tile:
    #   pf_big[p*b_tile + b, b*nrows3 + n] = pf[p, n]
    pf = _pool_select_matrix(H // 4, W // 4, repad=False)     # (n_pos, nrows3)
    nrows3 = pf.shape[1]
    pf_big = np.zeros((n_pos * b_tile, b_tile * nrows3), np.float32)
    for p in range(n_pos):
        for b in range(b_tile):
            pf_big[p * b_tile + b, b * nrows3:(b + 1) * nrows3] = pf[p]

    return {
        "w1": conv_w(params["w1"]), "b1": params["b1"].reshape(1, -1),
        "w2": conv_w(params["w2"]), "b2": params["b2"].reshape(1, -1),
        "w3": conv_w(params["w3"]), "b3": params["b3"].reshape(1, -1),
        "p1": jnp.asarray(p1), "p2": jnp.asarray(p2),
        "pf": jnp.asarray(pf_big),
        "wfc": wfc,
        "bf": params["bf"].reshape(1, -1),
    }


# ------------------------------ forward wrapper -------------------------------

def _full_spec(shape):
    n = len(shape)
    return pl.BlockSpec(shape, lambda g: (0,) * n)


@functools.partial(jax.jit, static_argnames=("image_size", "roll_fwd"))
def _forward_impl(x_nchw, pp, image_size, roll_fwd):
    B = x_nchw.shape[0]
    H, W = image_size
    hp, wp = H + 2, W + 2
    cin = x_nchw.shape[1]
    num_out = pp["bf"].shape[-1]
    n_pos = (H // 8) * (W // 8)

    # b_tile is baked into the block-diagonal selection matrices.
    b_tile = pp["p1"].shape[0] // ((H // 2 + 2) * (W // 2 + 2))
    nblk = -(-B // b_tile)
    pad_b = nblk * b_tile - B

    # Only XLA work in the hot path: lay the (tiny) network input out as
    # zero-ring padded rasters, b_tile images stacked along M per grid step.
    x = jnp.transpose(x_nchw, (0, 2, 3, 1))
    x = jnp.pad(x, ((0, pad_b), (1, 1), (1, 1), (0, 0)))
    x = x.reshape(nblk, b_tile * hp * wp, cin)

    kernel = functools.partial(_fused_cnn_kernel, W=W, b_tile=b_tile,
                               n_pos=n_pos, roll_fwd=roll_fwd)
    in_specs = [pl.BlockSpec((1, b_tile * hp * wp, cin), lambda g: (g, 0, 0))]
    operands = [x]
    for name in ("w1", "b1", "w2", "b2", "w3", "b3",
                 "p1", "p2", "pf", "wfc", "bf"):
        arr = pp[name]
        in_specs.append(_full_spec(arr.shape))
        operands.append(arr)

    out = pl.pallas_call(
        kernel,
        out_shape=jax.ShapeDtypeStruct((nblk, b_tile, num_out), jnp.float32),
        grid=(nblk,),
        in_specs=in_specs,
        out_specs=pl.BlockSpec((1, b_tile, num_out), lambda g: (g, 0, 0)),
        compiler_params=pltpu.CompilerParams(
            dimension_semantics=("parallel",)),
    )(*operands)
    return out.reshape(nblk * b_tile, num_out)[:B]


def simple_cnn_forward(x_nchw, pp, image_size):
    """Forward pass matching SimpleCNN.forward (NCHW input, like PyTorch)."""
    return _forward_impl(x_nchw, pp, image_size=image_size,
                         roll_fwd=_roll_follows_jnp_convention())


# ------------------------------ parameter init --------------------------------

def init_params(key, num_outputs, image_size):
    ks = jax.random.split(key, 8)
    flat = 64 * (image_size[0] // 8) * (image_size[1] // 8)

    def conv_w(k, cout, cin):
        return 0.1 * jax.random.normal(k, (cout, cin, 3, 3), jnp.float32)

    return {
        "w1": conv_w(ks[0], 16, 3),
        "b1": 0.01 * jax.random.normal(ks[1], (16,), jnp.float32),
        "w2": conv_w(ks[2], 32, 16),
        "b2": 0.01 * jax.random.normal(ks[3], (32,), jnp.float32),
        "w3": conv_w(ks[4], 64, 32),
        "b3": 0.01 * jax.random.normal(ks[5], (64,), jnp.float32),
        "wf": 0.1 * jax.random.normal(ks[6], (num_outputs, flat), jnp.float32),
        "bf": 0.01 * jax.random.normal(ks[7], (num_outputs,), jnp.float32),
    }


# --------------------------- pure-JAX reference -------------------------------

def reference_forward(x_nchw, params):
    def conv(x, w, b):
        y = jax.lax.conv_general_dilated(
            x, w, (1, 1), ((1, 1), (1, 1)),
            dimension_numbers=("NCHW", "OIHW", "NCHW"))
        return y + b.reshape(1, -1, 1, 1)

    def pool(x):
        return jax.lax.reduce_window(x, -jnp.inf, jax.lax.max,
                                     (1, 1, 2, 2), (1, 1, 2, 2), "VALID")

    x = pool(jax.nn.relu(conv(x_nchw, params["w1"], params["b1"])))
    x = pool(jax.nn.relu(conv(x, params["w2"], params["b2"])))
    x = pool(jax.nn.relu(conv(x, params["w3"], params["b3"])))
    x = x.reshape(x.shape[0], -1)
    return x @ params["wf"].T + params["bf"]


# ---------------------------------- main ---------------------------------------

if __name__ == "__main__":
    key = jax.random.PRNGKey(0)
    image_size = (16, 16)
    num_outputs = 10
    batch = 8            # 2 grid steps of b_tile=4 -> both v7x TCs used
    b_tile = 4

    kx, kp = jax.random.split(key)
    x = jax.random.normal(kx, (batch, 3, image_size[0], image_size[1]),
                          jnp.float32)
    params = init_params(kp, num_outputs, image_size)
    pparams = preprocess_params(params, image_size, b_tile=b_tile)

    out = jax.block_until_ready(
        simple_cnn_forward(x, pparams, image_size=image_size))
    assert out.shape == (batch, num_outputs), out.shape

    ref = jax.block_until_ready(reference_forward(x, params))
    # DEFAULT matmul precision (single-pass bf16 MXU operands, f32 accumulate);
    # tolerance sized accordingly.
    assert jnp.allclose(out, ref, atol=5e-3, rtol=5e-3), (
        float(jnp.max(jnp.abs(out - ref))))

    print("KERNEL_OK")
</pallas_src>

<mosaic_0001>
module attributes {stable_mosaic.version = 11 : i64} {
  func.func @probe(%arg0: memref<8x128xf32, #tpu.memory_space<vmem>>, %arg1: memref<8x128xf32, #tpu.memory_space<vmem>>) attributes {dimension_semantics = [], scalar_prefetch = 0 : i64, scratch_operands = 0 : i64, tpu.core_type = #tpu.core_type<tc>} {
    %c0 = arith.constant 0 : index
    %c0_0 = arith.constant 0 : index
    %0 = vector.load %arg0[%c0, %c0_0] : memref<8x128xf32, #tpu.memory_space<vmem>>, vector<8x128xf32>
    %c1_i32 = arith.constant 1 : i32
    %1 = tpu.dynamic_rotate %0 by %c1_i32 dim 0 : vector<8x128xf32>, i32 -> vector<8x128xf32>
    %c0_1 = arith.constant 0 : index
    %c0_2 = arith.constant 0 : index
    %2 = vector.load %arg1[%c0_1, %c0_2] : memref<8x128xf32, #tpu.memory_space<vmem>>, vector<8x128xf32>
    tpu.vector_store %arg1[%c0_1, %c0_2], %1 {strides = array<i32>} : memref<8x128xf32, #tpu.memory_space<vmem>>, vector<8x128xf32>,
    return
  }
}

</mosaic_0001>

<bundles_post_ra>
// kernel: tpu_custom_call.1
= control target key start
LH: loop header
LB: loop body
LE: loop exit
PB: predicated region body
PF: predicated region fallthrough
CT: control target
= control target key end

     0   :  { %6 = vsyncpa [#allocation3], 0  ;;  %s125_s0 = inlined_call_operand.hbm [shape: f32[8,128], index: 0, kind: input, shape index: {}]   ;;  %s126_s1 = inlined_call_operand.hbm [shape: f32[8,128], index: 1, kind: output, shape index: {}]  }
   0x1   :  { %7 = vsyncpa [#allocation4], 0  ;;  %s89_s6 = smov [#allocation2]   ;;  %s41_s10 = scalar_lea.hbm %s125_s0, 128 }
   0x2   :  { %s14_s7 = sshll.u32 %s89_s6, 4  ;;  %p42_p0 = scmp.ne.s32.totalorder %s125_s0, %s41_s10  ;;  %s15_s7 = int_to_ptr.vmem [resolvable:$true] %s14_s7 }
   0x3   :  { %p45_p1 = scmp.lt.u32.totalorder %s41_s10, %s125_s0 }
   0x5   :  { %p47_p2 = pnand %p45_p1, %p42_p0 }
   0x7   :  { %50 = shalt.err (!%p47_p2)
}
   0x8   :  { %s51_s15 = scalar_lea.vmem %s15_s7, 128  ;;  %p56_p4 = scmp.lt.s32.totalorder %s15_s7, %s15_s7 }
   0x9   :  { %p52_p3 = scmp.ne.s32.totalorder %s15_s7, %s51_s15  ;;  %p57_p5 = scmp.lt.s32.totalorder %s51_s15, %s51_s15 }
   0xb   :  { %p58_p6 = por %p57_p5, %p56_p4 }
   0xd   :  { %p59_p7 = pnand %p58_p6, %p52_p3 }
   0xf   :  { %62 = shalt.err (!%p59_p7)
}
  0x10   :  { %17 = dma.hbm_to_vmem [thread:$0]  %s125_s0, 128, %s15_s7, [#allocation3]  }
  0x11   :  { %85 = dma.done.wait [#allocation3], 128  }
  0x12   :  { %86 = vsyncadd [#allocation3], 4294967168  ;;  %s90_s18 = smov [#allocation5]   ;;  %v21_v0 = vld [vmem:[#allocation2] sm:$0xff] }
  0x13   :  { %s30_s19 = sshll.u32 %s90_s18, 4  ;;  %v22_v1 = vrot.slane %v21_v0, 7  ;;  %s31_s19 = int_to_ptr.vmem [resolvable:$true] %s30_s19 }
  0x14   :  { %s63_s20 = scalar_lea.vmem %s31_s19, 128  ;;  %p68_p9 = scmp.lt.s32.totalorder %s31_s19, %s31_s19 }
  0x15   :  { %23 = vst [vmem:[#allocation5] sm:$0xff] %v22_v1  ;;  %p64_p8 = scmp.ne.s32.totalorder %s31_s19, %s63_s20  ;;  %p69_p10 = scmp.lt.s32.totalorder %s63_s20, %s63_s20 }
  0x17   :  { %p70_p11 = por %p69_p10, %p68_p9 }
  0x19   :  { %p71_p12 = pnand %p70_p11, %p64_p8 }
  0x1b   :  { %74 = shalt.err (!%p71_p12)
}
  0x1c   :  { %s75_s23 = scalar_lea.hbm %s126_s1, 128 }
  0x1d   :  { %p76_p13 = scmp.ne.s32.totalorder %s126_s1, %s75_s23  ;;  %p79_p0 = scmp.lt.u32.totalorder %s75_s23, %s126_s1 }
  0x1f   :  { %p81_p1 = pnand %p79_p0, %p76_p13 }
  0x21   :  { %84 = shalt.err (!%p81_p1)
}
  0x22   :  { %33 = dma.vmem_to_hbm [thread:$0]  %s31_s19, 128, %s126_s1, [#allocation4]  }
  0x23   :  { %87 = dma.done.wait [#allocation4], 128  }
  0x24   :  { %88 = vsyncadd [#allocation4], 4294967168 }
  0x25   :  { %37 = vsyncpa [#allocation3], 1 }
  0x26   :  { %38 = vsyncpa [#allocation4], 1 }

</bundles_post_ra>
